<compile_context>
chip_gen: v7x
topology: tpu7x:2x2x1
jax: 0.10.0
libtpu: 0.0.40
codegen_flags: <defaults>
</compile_context>

<pallas_src>
import jax
import jax.numpy as jnp
from jax.experimental import pallas as pl
from jax.experimental.pallas import tpu as pltpu

B, C, H, W = 2, 3, 16, 16
D = C * H * W                 # 768
NUM_CAT = 4                   # arch.num_cat (use_minst=False)
HIDDEN = 32

MP = 8                        # padded row count (sublane multiple)
HP = 128                      # HIDDEN padded to a full lane vreg
NP = 128                      # NUM_CAT padded to a full lane vreg
DOT_DT = jnp.bfloat16         # MXU operand dtype (accumulation stays f32)

# ---- packed-slab row offsets (all multiples of 8) ---------------------------
# slab A: lane width = D (768)
ROW_X   = 0                    # (MP, D)   padded input images
ROW_WD2 = ROW_X + MP           # (HP, D)   decoder layer-2 weight
ROW_BD2 = ROW_WD2 + HP         # (MP, D)   decoder layer-2 bias (row-broadcast)
SLAB_A_ROWS = ROW_BD2 + MP     # 144

# slab B: lane width = 128
ROW_WE1 = 0                    # (D, HP)   encoder layer-1 weight
ROW_BE1 = ROW_WE1 + D          # (MP, HP)
ROW_WE2 = ROW_BE1 + MP         # (HP, NP)
ROW_BE2 = ROW_WE2 + HP         # (MP, NP)
ROW_WD1 = ROW_BE2 + MP         # (NP, HP)
ROW_BD1 = ROW_WD1 + NP         # (MP, HP)
ROW_G   = ROW_BD1 + MP         # (MP, NP)  gumbel noise
SLAB_B_ROWS = ROW_G + MP       # 1056


def qvae_kernel(slab_a_ref, slab_b_ref, loss_ref, dec_out_ref, qcat_ref):
    # ---------- unpack slabs (static, 8-aligned row slices) ----------
    x   = slab_a_ref[ROW_X:ROW_X + MP, :]            # (8, 768)  f32
    wd2 = slab_a_ref[ROW_WD2:ROW_WD2 + HP, :]        # (128, 768)
    bd2 = slab_a_ref[ROW_BD2:ROW_BD2 + MP, :]        # (8, 768)

    we1 = slab_b_ref[ROW_WE1:ROW_WE1 + D, :]         # (768, 128)
    be1 = slab_b_ref[ROW_BE1:ROW_BE1 + MP, :]        # (8, 128)
    we2 = slab_b_ref[ROW_WE2:ROW_WE2 + HP, :]        # (128, 128)
    be2 = slab_b_ref[ROW_BE2:ROW_BE2 + MP, :]        # (8, 128)
    wd1 = slab_b_ref[ROW_WD1:ROW_WD1 + NP, :]        # (128, 128)
    bd1 = slab_b_ref[ROW_BD1:ROW_BD1 + MP, :]        # (8, 128)
    g   = slab_b_ref[ROW_G:ROW_G + MP, :]            # (8, 128)

    # ---------- encoder MLP: D -> HIDDEN(pad 128) -> NUM_CAT(pad 128) ----------
    h = jnp.dot(x.astype(DOT_DT), we1.astype(DOT_DT),
                preferred_element_type=jnp.float32) + be1
    h = jnp.maximum(h, 0.0)
    z = jnp.dot(h.astype(DOT_DT), we2.astype(DOT_DT),
                preferred_element_type=jnp.float32) + be2          # (8, 128)

    lane = jax.lax.broadcasted_iota(jnp.int32, (MP, NP), 1)
    row  = jax.lax.broadcasted_iota(jnp.int32, (MP, NP), 0)
    valid_lane = lane < NUM_CAT

    # ---------- gumbel softmax (tau=1, hard=False) over the NUM_CAT lanes ----------
    logits = jnp.where(valid_lane, z + g, -1e30)
    logits = logits - jnp.max(logits, axis=-1, keepdims=True)
    ex = jnp.where(valid_lane, jnp.exp(logits), 0.0)
    q = ex / jnp.sum(ex, axis=-1, keepdims=True)                   # (8, 128)

    # ---------- fused decoder operand: rows [0,B)=q, rows [B,B+NUM_CAT)=eye ----------
    eye_rows = jnp.where((row >= B) & valid_lane & (lane == row - B), 1.0, 0.0)
    dec_in = jnp.where(row < B, q, eye_rows)                       # (8, 128)

    h2 = jnp.dot(dec_in.astype(DOT_DT), wd1.astype(DOT_DT),
                 preferred_element_type=jnp.float32) + bd1
    h2 = jnp.maximum(h2, 0.0)
    dec_out = jnp.dot(h2.astype(DOT_DT), wd2.astype(DOT_DT),
                      preferred_element_type=jnp.float32) + bd2    # (8, 768)
    dec_out_ref[...] = dec_out

    # ---------- loss = mse(recon, x, 'none').sum([1,2,3]).mean() (real rows only) ----------
    row_d = jax.lax.broadcasted_iota(jnp.int32, (MP, D), 0)
    diff = jnp.where(row_d < B, dec_out - x, 0.0)
    loss_ref[0, 0] = jnp.sum(diff * diff) * (1.0 / float(B))

    # ---------- enc_x_cat = softmax(q, dim=-1) (double softmax, exactly as the reference) ----------
    qm = jnp.where(valid_lane, q, -1e30)
    qm = qm - jnp.max(qm, axis=-1, keepdims=True)
    eq = jnp.where(valid_lane, jnp.exp(qm), 0.0)
    qcat_ref[...] = eq / jnp.sum(eq, axis=-1, keepdims=True)       # (8, 128)


def init_params(key):
    ks = jax.random.split(key, 4)
    s = 0.1
    we1 = jax.random.normal(ks[0], (D, HIDDEN), jnp.float32) * s
    be1 = jnp.zeros((1, HIDDEN), jnp.float32)
    we2 = jax.random.normal(ks[1], (HIDDEN, NUM_CAT), jnp.float32) * s
    be2 = jnp.zeros((1, NUM_CAT), jnp.float32)
    wd1 = jax.random.normal(ks[2], (NUM_CAT, HIDDEN), jnp.float32) * s
    bd1 = jnp.zeros((1, HIDDEN), jnp.float32)
    wd2 = jax.random.normal(ks[3], (HIDDEN, D), jnp.float32) * s
    bd2 = jnp.zeros((1, D), jnp.float32)
    return (we1, be1, we2, be2, wd1, bd1, wd2, bd2)


def _pad_rows_cols(a, rows, cols):
    out = jnp.zeros((rows, cols), jnp.float32)
    return out.at[: a.shape[0], : a.shape[1]].set(a.astype(jnp.float32))


def pack_slabs(x_flat, params, gumbel_noise):
    """Pack x + gumbel + all 8 params into two lane-dense f32 slabs."""
    we1, be1, we2, be2, wd1, bd1, wd2, bd2 = params
    slab_a = jnp.concatenate([
        _pad_rows_cols(x_flat, MP, D),                              # ROW_X
        _pad_rows_cols(wd2, HP, D),                                 # ROW_WD2
        jnp.broadcast_to(bd2, (MP, D)).astype(jnp.float32),         # ROW_BD2
    ], axis=0)                                                      # (144, 768)
    slab_b = jnp.concatenate([
        _pad_rows_cols(we1, D, HP),                                 # ROW_WE1
        _pad_rows_cols(jnp.broadcast_to(be1, (MP, HIDDEN)), MP, HP),  # ROW_BE1
        _pad_rows_cols(we2, HP, NP),                                # ROW_WE2
        _pad_rows_cols(jnp.broadcast_to(be2, (MP, NUM_CAT)), MP, NP),  # ROW_BE2
        _pad_rows_cols(wd1, NP, HP),                                # ROW_WD1
        _pad_rows_cols(jnp.broadcast_to(bd1, (MP, HIDDEN)), MP, HP),  # ROW_BD1
        _pad_rows_cols(gumbel_noise, MP, NP),                       # ROW_G
    ], axis=0)                                                      # (1056, 128)
    return slab_a, slab_b


@jax.jit
def qvae_forward(x, params, gumbel_noise):
    """x: (B, C, H, W) float32 NCHW.  Returns (loss, zero, infos)."""
    x_flat = x.reshape(B, D)
    slab_a, slab_b = pack_slabs(x_flat, params, gumbel_noise)

    vmem = pl.BlockSpec(memory_space=pltpu.MemorySpace.VMEM)
    smem = pl.BlockSpec(memory_space=pltpu.MemorySpace.SMEM)
    loss, dec_out, qcat_pad = pl.pallas_call(
        qvae_kernel,
        out_shape=(
            jax.ShapeDtypeStruct((1, 1), jnp.float32),      # loss (SMEM scalar)
            jax.ShapeDtypeStruct((MP, D), jnp.float32),     # fused decoder output
            jax.ShapeDtypeStruct((MP, NP), jnp.float32),    # softmax(q), padded
        ),
        in_specs=[vmem, vmem],
        out_specs=(smem, vmem, vmem),
    )(slab_a, slab_b)

    loss = loss[0, 0]
    # rows [B, B+NUM_CAT) of the fused decoder output are dec(eye(num_cat))
    recon_eye = dec_out[B:B + NUM_CAT].reshape(NUM_CAT, C, H, W)
    # einops.repeat(dec(eye), 'n c h w -> b n c h w', b=B)
    recon_x = jnp.broadcast_to(recon_eye[None], (B, NUM_CAT, C, H, W))
    q_cat = qcat_pad[:B, :NUM_CAT]
    zero = jnp.float32(0.0)   # self.zero = torch.Tensor([0]).mean()
    infos = dict(recon_x=recon_x, enc_x=zero, enc_x_cat=q_cat)
    return loss, zero, infos


if __name__ == "__main__":
    key = jax.random.PRNGKey(0)
    kx, kg, kp = jax.random.split(key, 3)

    x = jax.random.uniform(kx, (B, C, H, W), jnp.float32)
    # Gumbel noise for F.gumbel_softmax (stochastic in torch; supplied by caller here).
    # TODO(synk): use pltpu.prng_seed/prng_random_bits if on-device sampling is wanted.
    gumbel = jax.random.gumbel(kg, (B, NUM_CAT), jnp.float32)
    params = init_params(kp)

    loss, zero, infos = qvae_forward(x, params, gumbel)
    jax.block_until_ready((loss, zero, infos))

    assert loss.shape == ()
    assert bool(jnp.isfinite(loss))
    assert infos["recon_x"].shape == (B, NUM_CAT, C, H, W)
    assert infos["enc_x_cat"].shape == (B, NUM_CAT)
    # each row of enc_x_cat is a softmax -> sums to 1
    assert bool(jnp.allclose(infos["enc_x_cat"].sum(-1), 1.0, atol=1e-5))
    print("KERNEL_OK")
</pallas_src>

<mosaic_0001>
module attributes {stable_mosaic.version = 11 : i64} {
  func.func @qvae_kernel(%arg0: memref<144x768xf32, #tpu.memory_space<vmem>>, %arg1: memref<1056x128xf32, #tpu.memory_space<vmem>>, %arg2: memref<1x1xf32, #tpu.memory_space<smem>>, %arg3: memref<8x768xf32, #tpu.memory_space<vmem>>, %arg4: memref<8x128xf32, #tpu.memory_space<vmem>>) attributes {dimension_semantics = [], scalar_prefetch = 0 : i64, scratch_operands = 0 : i64, tpu.core_type = #tpu.core_type<tc>} {
    %c0 = arith.constant 0 : index
    %c0_0 = arith.constant 0 : index
    %0 = vector.load %arg0[%c0, %c0_0] : memref<144x768xf32, #tpu.memory_space<vmem>>, vector<8x768xf32>
    %c8 = arith.constant 8 : index
    %c0_1 = arith.constant 0 : index
    %1 = vector.load %arg0[%c8, %c0_1] : memref<144x768xf32, #tpu.memory_space<vmem>>, vector<128x768xf32>
    %c136 = arith.constant 136 : index
    %c0_2 = arith.constant 0 : index
    %2 = vector.load %arg0[%c136, %c0_2] : memref<144x768xf32, #tpu.memory_space<vmem>>, vector<8x768xf32>
    %c0_3 = arith.constant 0 : index
    %c0_4 = arith.constant 0 : index
    %3 = vector.load %arg1[%c0_3, %c0_4] : memref<1056x128xf32, #tpu.memory_space<vmem>>, vector<768x128xf32>
    %c768 = arith.constant 768 : index
    %c0_5 = arith.constant 0 : index
    %4 = vector.load %arg1[%c768, %c0_5] : memref<1056x128xf32, #tpu.memory_space<vmem>>, vector<8x128xf32>
    %c776 = arith.constant 776 : index
    %c0_6 = arith.constant 0 : index
    %5 = vector.load %arg1[%c776, %c0_6] : memref<1056x128xf32, #tpu.memory_space<vmem>>, vector<128x128xf32>
    %c904 = arith.constant 904 : index
    %c0_7 = arith.constant 0 : index
    %6 = vector.load %arg1[%c904, %c0_7] : memref<1056x128xf32, #tpu.memory_space<vmem>>, vector<8x128xf32>
    %c912 = arith.constant 912 : index
    %c0_8 = arith.constant 0 : index
    %7 = vector.load %arg1[%c912, %c0_8] : memref<1056x128xf32, #tpu.memory_space<vmem>>, vector<128x128xf32>
    %c1040 = arith.constant 1040 : index
    %c0_9 = arith.constant 0 : index
    %8 = vector.load %arg1[%c1040, %c0_9] : memref<1056x128xf32, #tpu.memory_space<vmem>>, vector<8x128xf32>
    %c1048 = arith.constant 1048 : index
    %c0_10 = arith.constant 0 : index
    %9 = vector.load %arg1[%c1048, %c0_10] : memref<1056x128xf32, #tpu.memory_space<vmem>>, vector<8x128xf32>
    %10 = arith.truncf %0 : vector<8x768xf32> to vector<8x768xbf16>
    %11 = arith.truncf %3 : vector<768x128xf32> to vector<768x128xbf16>
    %cst = arith.constant dense<0.000000e+00> : vector<8x128xf32>
    %12 = tpu.matmul %10, %11, %cst {dimension_numbers = #tpu.dot_dimension_numbers<[1], [0], [0], [1], [0, 0, 1, 1], [], []>} : vector<8x768xbf16>, vector<768x128xbf16>, vector<8x128xf32> -> vector<8x128xf32>
    %13 = arith.addf %12, %4 : vector<8x128xf32>
    %cst_11 = arith.constant 0.000000e+00 : f32
    %14 = vector.broadcast %cst_11 : f32 to vector<8x128xf32>
    %15 = arith.maximumf %13, %14 : vector<8x128xf32>
    %16 = arith.truncf %15 : vector<8x128xf32> to vector<8x128xbf16>
    %17 = arith.truncf %5 : vector<128x128xf32> to vector<128x128xbf16>
    %cst_12 = arith.constant dense<0.000000e+00> : vector<8x128xf32>
    %18 = tpu.matmul %16, %17, %cst_12 {dimension_numbers = #tpu.dot_dimension_numbers<[1], [0], [0], [1], [0, 0, 1, 1], [], []>} : vector<8x128xbf16>, vector<128x128xbf16>, vector<8x128xf32> -> vector<8x128xf32>
    %19 = arith.addf %18, %6 : vector<8x128xf32>
    %20 = tpu.iota {dimensions = array<i32: 1>} : vector<8x128xi32>
    %21 = tpu.iota {dimensions = array<i32: 0>} : vector<8x128xi32>
    %c4_i32 = arith.constant 4 : i32
    %22 = vector.broadcast %c4_i32 : i32 to vector<8x128xi32>
    %23 = arith.cmpi slt, %20, %22 : vector<8x128xi32>
    %24 = arith.addf %19, %9 : vector<8x128xf32>
    %cst_13 = arith.constant -1.000000e+30 : f32
    %25 = vector.broadcast %cst_13 : f32 to vector<8x128xf32>
    %26 = arith.select %23, %24, %25 : vector<8x128xi1>, vector<8x128xf32>
    %cst_14 = arith.constant dense<0xFF800000> : vector<8xf32>
    %27 = vector.multi_reduction <maximumf>, %26, %cst_14 [1] : vector<8x128xf32> to vector<8xf32>
    %28 = vector.shape_cast %27 : vector<8xf32> to vector<8x1xf32>
    %29 = vector.broadcast %28 : vector<8x1xf32> to vector<8x128xf32>
    %30 = arith.subf %26, %29 : vector<8x128xf32>
    %31 = math.exp %30 : vector<8x128xf32>
    %cst_15 = arith.constant 0.000000e+00 : f32
    %32 = vector.broadcast %cst_15 : f32 to vector<8x128xf32>
    %33 = arith.select %23, %31, %32 : vector<8x128xi1>, vector<8x128xf32>
    %cst_16 = arith.constant dense<0.000000e+00> : vector<8xf32>
    %34 = vector.multi_reduction <add>, %33, %cst_16 [1] : vector<8x128xf32> to vector<8xf32>
    %35 = vector.shape_cast %34 : vector<8xf32> to vector<8x1xf32>
    %36 = vector.broadcast %35 : vector<8x1xf32> to vector<8x128xf32>
    %37 = arith.divf %33, %36 : vector<8x128xf32>
    %c2_i32 = arith.constant 2 : i32
    %38 = vector.broadcast %c2_i32 : i32 to vector<8x128xi32>
    %39 = arith.cmpi sge, %21, %38 : vector<8x128xi32>
    %40 = arith.andi %39, %23 : vector<8x128xi1>
    %c2_i32_17 = arith.constant 2 : i32
    %41 = vector.broadcast %c2_i32_17 : i32 to vector<8x128xi32>
    %42 = arith.subi %21, %41 : vector<8x128xi32>
    %43 = arith.cmpi eq, %20, %42 : vector<8x128xi32>
    %44 = arith.andi %40, %43 : vector<8x128xi1>
    %cst_18 = arith.constant 1.000000e+00 : f32
    %cst_19 = arith.constant 0.000000e+00 : f32
    %45 = vector.broadcast %cst_18 : f32 to vector<8x128xf32>
    %46 = vector.broadcast %cst_19 : f32 to vector<8x128xf32>
    %47 = arith.select %44, %45, %46 : vector<8x128xi1>, vector<8x128xf32>
    %c2_i32_20 = arith.constant 2 : i32
    %48 = vector.broadcast %c2_i32_20 : i32 to vector<8x128xi32>
    %49 = arith.cmpi slt, %21, %48 : vector<8x128xi32>
    %50 = arith.select %49, %37, %47 : vector<8x128xi1>, vector<8x128xf32>
    %51 = arith.truncf %50 : vector<8x128xf32> to vector<8x128xbf16>
    %52 = arith.truncf %7 : vector<128x128xf32> to vector<128x128xbf16>
    %cst_21 = arith.constant dense<0.000000e+00> : vector<8x128xf32>
    %53 = tpu.matmul %51, %52, %cst_21 {dimension_numbers = #tpu.dot_dimension_numbers<[1], [0], [0], [1], [0, 0, 1, 1], [], []>} : vector<8x128xbf16>, vector<128x128xbf16>, vector<8x128xf32> -> vector<8x128xf32>
    %54 = arith.addf %53, %8 : vector<8x128xf32>
    %cst_22 = arith.constant 0.000000e+00 : f32
    %55 = vector.broadcast %cst_22 : f32 to vector<8x128xf32>
    %56 = arith.maximumf %54, %55 : vector<8x128xf32>
    %57 = arith.truncf %56 : vector<8x128xf32> to vector<8x128xbf16>
    %58 = arith.truncf %1 : vector<128x768xf32> to vector<128x768xbf16>
    %cst_23 = arith.constant dense<0.000000e+00> : vector<8x768xf32>
    %59 = tpu.matmul %57, %58, %cst_23 {dimension_numbers = #tpu.dot_dimension_numbers<[1], [0], [0], [1], [0, 0, 1, 1], [], []>} : vector<8x128xbf16>, vector<128x768xbf16>, vector<8x768xf32> -> vector<8x768xf32>
    %60 = arith.addf %59, %2 : vector<8x768xf32>
    %c0_24 = arith.constant 0 : index
    %c0_25 = arith.constant 0 : index
    %61 = vector.load %arg3[%c0_24, %c0_25] : memref<8x768xf32, #tpu.memory_space<vmem>>, vector<8x768xf32>
    tpu.vector_store %arg3[%c0_24, %c0_25], %60 {strides = array<i32>} : memref<8x768xf32, #tpu.memory_space<vmem>>, vector<8x768xf32>,
    %62 = tpu.iota {dimensions = array<i32: 0>} : vector<8x768xi32>
    %c2_i32_26 = arith.constant 2 : i32
    %63 = vector.broadcast %c2_i32_26 : i32 to vector<8x768xi32>
    %64 = arith.cmpi slt, %62, %63 : vector<8x768xi32>
    %65 = arith.subf %60, %0 : vector<8x768xf32>
    %cst_27 = arith.constant 0.000000e+00 : f32
    %66 = vector.broadcast %cst_27 : f32 to vector<8x768xf32>
    %67 = arith.select %64, %65, %66 : vector<8x768xi1>, vector<8x768xf32>
    %68 = arith.mulf %67, %67 : vector<8x768xf32>
    %69 = vector.shape_cast %68 : vector<8x768xf32> to vector<1x8x768xf32>
    %cst_28 = arith.constant dense<0.000000e+00> : vector<1xf32>
    %70 = vector.multi_reduction <add>, %69, %cst_28 [1, 2] : vector<1x8x768xf32> to vector<1xf32>
    %71 = vector.shape_cast %70 : vector<1xf32> to vector<1x1x1xf32>
    %72 = vector.extract %71[0, 0, 0] : f32 from vector<1x1x1xf32>
    %cst_29 = arith.constant 5.000000e-01 : f32
    %73 = arith.mulf %72, %cst_29 : f32
    %c0_30 = arith.constant 0 : index
    %c0_31 = arith.constant 0 : index
    %74 = memref.load %arg2[%c0_30, %c0_31] : memref<1x1xf32, #tpu.memory_space<smem>>
    memref.store %73, %arg2[%c0_30, %c0_31] : memref<1x1xf32, #tpu.memory_space<smem>>
    %cst_32 = arith.constant -1.000000e+30 : f32
    %75 = vector.broadcast %cst_32 : f32 to vector<8x128xf32>
    %76 = arith.select %23, %37, %75 : vector<8x128xi1>, vector<8x128xf32>
    %cst_33 = arith.constant dense<0xFF800000> : vector<8xf32>
    %77 = vector.multi_reduction <maximumf>, %76, %cst_33 [1] : vector<8x128xf32> to vector<8xf32>
    %78 = vector.shape_cast %77 : vector<8xf32> to vector<8x1xf32>
    %79 = vector.broadcast %78 : vector<8x1xf32> to vector<8x128xf32>
    %80 = arith.subf %76, %79 : vector<8x128xf32>
    %81 = math.exp %80 : vector<8x128xf32>
    %cst_34 = arith.constant 0.000000e+00 : f32
    %82 = vector.broadcast %cst_34 : f32 to vector<8x128xf32>
    %83 = arith.select %23, %81, %82 : vector<8x128xi1>, vector<8x128xf32>
    %cst_35 = arith.constant dense<0.000000e+00> : vector<8xf32>
    %84 = vector.multi_reduction <add>, %83, %cst_35 [1] : vector<8x128xf32> to vector<8xf32>
    %85 = vector.shape_cast %84 : vector<8xf32> to vector<8x1xf32>
    %86 = vector.broadcast %85 : vector<8x1xf32> to vector<8x128xf32>
    %87 = arith.divf %83, %86 : vector<8x128xf32>
    %c0_36 = arith.constant 0 : index
    %c0_37 = arith.constant 0 : index
    %88 = vector.load %arg4[%c0_36, %c0_37] : memref<8x128xf32, #tpu.memory_space<vmem>>, vector<8x128xf32>
    tpu.vector_store %arg4[%c0_36, %c0_37], %87 {strides = array<i32>} : memref<8x128xf32, #tpu.memory_space<vmem>>, vector<8x128xf32>,
    return
  }
}

</mosaic_0001>

<bundles_post_ra>
// kernel: qvae_forward.1
= control target key start
LH: loop header
LB: loop body
LE: loop exit
PB: predicated region body
PF: predicated region fallthrough
CT: control target
= control target key end

     0   :  { %s1826_s0 = inlined_call_operand.vmem [shape: f32[144,768], index: 0, kind: input, shape index: {}]   ;;  %s1827_s1 = inlined_call_operand.vmem [shape: f32[1056,128], index: 1, kind: input, shape index: {}]   ;;  %s1828_s2 = inlined_call_operand.hbm [shape: f32[1,1], index: 2, kind: output, shape index: {0}]   ;;  %s1829_s3 = inlined_call_operand.vmem [shape: f32[8,768], index: 3, kind: output, shape index: {1}]   ;;  %s1830_s4 = inlined_call_operand.vmem [shape: f32[8,128], index: 4, kind: output, shape index: {2}]  }
   0x1   :  { %v140_v0 = vld [vmem:[%s1827_s1 + $0x80] sm:$0xff]  ;;  %v141_v1 = vld [vmem:[%s1827_s1 + $0x88] sm:$0xff]  ;;  %v142_v11 = vld [vmem:[%s1827_s1 + $0x90] sm:$0xff] }
   0x2   :  { %v124_v2 = vld [vmem:[%s1827_s1] sm:$0xff]  ;;  %v270_v3 = vpack.c.bf16 %v141_v1, %v140_v0  ;;  %v125_v4 = vld [vmem:[%s1827_s1 + $0x8] sm:$0xff]  ;;  %v143_v13 = vld [vmem:[%s1827_s1 + $0x98] sm:$0xff] }
   0x3   :  { %v172_v5 = vld [vmem:[%s1827_s1 + $0x180] sm:$0xff]  ;;  %v173_v6 = vld [vmem:[%s1827_s1 + $0x188] sm:$0xff]  ;;  %v262_v7 = vpack.c.bf16 %v125_v4, %v124_v2  ;;  %v126_v14 = vld [vmem:[%s1827_s1 + $0x10] sm:$0xff]  ;;  %v271_v16 = vpack.c.bf16 %v143_v13, %v142_v11 }
   0x4   :  { %v286_v8 = vpack.c.bf16 %v173_v6, %v172_v5  ;;  %v156_v9 = vld [vmem:[%s1827_s1 + $0x100] sm:$0xff]  ;;  %v157_v10 = vld [vmem:[%s1827_s1 + $0x108] sm:$0xff]  ;;  %802 = vmatprep.subr.bf16.mxu0 %v270_v3  ;;  %v127_v15 = vld [vmem:[%s1827_s1 + $0x18] sm:$0xff] }
   0x5   :  { %v278_v12 = vpack.c.bf16 %v157_v10, %v156_v9  ;;  %803 = vmatpush3.bf16.msra.mxu0 %v262_v7  ;;  %v263_v17 = vpack.c.bf16 %v127_v15, %v126_v14  ;;  %v174_v18 = vld [vmem:[%s1827_s1 + $0x190] sm:$0xff]  ;;  %v175_v19 = vld [vmem:[%s1827_s1 + $0x198] sm:$0xff]  ;;  %v144_v23 = vld [vmem:[%s1827_s1 + $0xa0] sm:$0xff] }
   0x6   :  { %824 = vmatprep.subr.bf16.mxu1 %v286_v8  ;;  %v158_v20 = vld [vmem:[%s1827_s1 + $0x110] sm:$0xff]  ;;  %v287_v21 = vpack.c.bf16 %v175_v19, %v174_v18  ;;  %v159_v22 = vld [vmem:[%s1827_s1 + $0x118] sm:$0xff]  ;;  %v145_v24 = vld [vmem:[%s1827_s1 + $0xa8] sm:$0xff]  ;;  %804 = vmatprep.subr.bf16.mxu0 %v271_v16 }
   0x7   :  { %825 = vmatpush3.bf16.msra.mxu1 %v278_v12  ;;  %v279_v25 = vpack.c.bf16 %v159_v22, %v158_v20  ;;  %v272_v26 = vpack.c.bf16 %v145_v24, %v144_v23  ;;  %v128_v27 = vld [vmem:[%s1827_s1 + $0x20] sm:$0xff]  ;;  %v129_v28 = vld [vmem:[%s1827_s1 + $0x28] sm:$0xff]  ;;  %v146_v35 = vld [vmem:[%s1827_s1 + $0xb0] sm:$0xff] }
   0x8   :  { %v176_v29 = vld [vmem:[%s1827_s1 + $0x1a0] sm:$0xff]  ;;  %826 = vmatprep.subr.bf16.mxu1 %v287_v21  ;;  %v177_v30 = vld [vmem:[%s1827_s1 + $0x1a8] sm:$0xff]  ;;  %v264_v33 = vpack.c.bf16 %v129_v28, %v128_v27  ;;  %v147_v36 = vld [vmem:[%s1827_s1 + $0xb8] sm:$0xff] }
   0x9   :  { %v160_v31 = vld [vmem:[%s1827_s1 + $0x120] sm:$0xff]  ;;  %v161_v32 = vld [vmem:[%s1827_s1 + $0x128] sm:$0xff]  ;;  %805 = vmatpush3.bf16.msra.mxu0 %v263_v17  ;;  %v288_v34 = vpack.c.bf16 %v177_v30, %v176_v29  ;;  %v130_v37 = vld [vmem:[%s1827_s1 + $0x30] sm:$0xff]  ;;  %v273_v39 = vpack.c.bf16 %v147_v36, %v146_v35 }
   0xa   :  { %806 = vmatprep.subr.bf16.mxu0 %v272_v26  ;;  %v280_v38 = vpack.c.bf16 %v161_v32, %v160_v31  ;;  %v131_v40 = vld [vmem:[%s1827_s1 + $0x38] sm:$0xff]  ;;  %v178_v41 = vld [vmem:[%s1827_s1 + $0x1b0] sm:$0xff]  ;;  %v148_v46 = vld [vmem:[%s1827_s1 + $0xc0] sm:$0xff] }
   0xb   :  { %827 = vmatpush3.bf16.msra.mxu1 %v279_v25  ;;  %v179_v42 = vld [vmem:[%s1827_s1 + $0x1b8] sm:$0xff]  ;;  %v162_v44 = vld [vmem:[%s1827_s1 + $0x130] sm:$0xff]  ;;  %v149_v47 = vld [vmem:[%s1827_s1 + $0xc8] sm:$0xff]  ;;  %v265_v48 = vpack.c.bf16 %v131_v40, %v130_v37 }
   0xc   :  { %828 = vmatprep.subr.bf16.mxu1 %v288_v34  ;;  %v289_v43 = vpack.c.bf16 %v179_v42, %v178_v41  ;;  %v163_v45 = vld [vmem:[%s1827_s1 + $0x138] sm:$0xff]  ;;  %v180_v49 = vld [vmem:[%s1827_s1 + $0x1c0] sm:$0xff]  ;;  %v181_v50 = vld [vmem:[%s1827_s1 + $0x1c8] sm:$0xff]  ;;  %v274_v52 = vpack.c.bf16 %v149_v47, %v148_v46 }
   0xd   :  { %807 = vmatpush3.bf16.msra.mxu0 %v264_v33  ;;  %v281_v51 = vpack.c.bf16 %v163_v45, %v162_v44  ;;  %v132_v53 = vld [vmem:[%s1827_s1 + $0x40] sm:$0xff]  ;;  %v133_v54 = vld [vmem:[%s1827_s1 + $0x48] sm:$0xff]  ;;  %v290_v56 = vpack.c.bf16 %v181_v50, %v180_v49  ;;  %v150_v58 = vld [vmem:[%s1827_s1 + $0xd0] sm:$0xff] }
   0xe   :  { %808 = vmatprep.subr.bf16.mxu0 %v273_v39  ;;  %v164_v55 = vld [vmem:[%s1827_s1 + $0x140] sm:$0xff]  ;;  %v165_v57 = vld [vmem:[%s1827_s1 + $0x148] sm:$0xff]  ;;  %v151_v59 = vld [vmem:[%s1827_s1 + $0xd8] sm:$0xff]  ;;  %v266_v62 = vpack.c.bf16 %v133_v54, %v132_v53 }
   0xf   :  { %829 = vmatpush3.bf16.msra.mxu1 %v280_v38  ;;  %v182_v60 = vld [vmem:[%s1827_s1 + $0x1d0] sm:$0xff]  ;;  %v183_v61 = vld [vmem:[%s1827_s1 + $0x1d8] sm:$0xff]  ;;  %v282_v63 = vpack.c.bf16 %v165_v57, %v164_v55  ;;  %v275_v0 = vpack.c.bf16 %v151_v59, %v150_v58  ;;  %v152_v6 = vld [vmem:[%s1827_s1 + $0xe0] sm:$0xff] }
  0x10   :  { %830 = vmatprep.subr.bf16.mxu1 %v289_v43  ;;  %v134_v1 = vld [vmem:[%s1827_s1 + $0x50] sm:$0xff]  ;;  %v135_v2 = vld [vmem:[%s1827_s1 + $0x58] sm:$0xff]  ;;  %v291_v4 = vpack.c.bf16 %v183_v61, %v182_v60  ;;  %v153_v7 = vld [vmem:[%s1827_s1 + $0xe8] sm:$0xff] }
  0x11   :  { %809 = vmatpush3.bf16.msra.mxu0 %v265_v48  ;;  %v166_v3 = vld [vmem:[%s1827_s1 + $0x150] sm:$0xff]  ;;  %v167_v5 = vld [vmem:[%s1827_s1 + $0x158] sm:$0xff]  ;;  %v184_v8 = vld [vmem:[%s1827_s1 + $0x1e0] sm:$0xff]  ;;  %v267_v10 = vpack.c.bf16 %v135_v2, %v134_v1  ;;  %v276_v14 = vpack.c.bf16 %v153_v7, %v152_v6 }
  0x12   :  { %810 = vmatprep.subr.bf16.mxu0 %v274_v52  ;;  %v185_v9 = vld [vmem:[%s1827_s1 + $0x1e8] sm:$0xff]  ;;  %v136_v11 = vld [vmem:[%s1827_s1 + $0x60] sm:$0xff]  ;;  %v283_v13 = vpack.c.bf16 %v167_v5, %v166_v3  ;;  %v154_v20 = vld [vmem:[%s1827_s1 + $0xf0] sm:$0xff] }
  0x13   :  { %831 = vmatpush3.bf16.msra.mxu1 %v281_v51  ;;  %v1143_v12 = vld [vmem:[%s1826_s0 + $0x8] sm:$0xff]  ;;  %v168_v16 = vld [vmem:[%s1827_s1 + $0x160] sm:$0xff]  ;;  %v292_v19 = vpack.c.bf16 %v185_v9, %v184_v8  ;;  %v155_v21 = vld [vmem:[%s1827_s1 + $0xf8] sm:$0xff] }
  0x14   :  { %832 = vmatprep.subr.bf16.mxu1 %v290_v56  ;;  %v137_v15 = vld [vmem:[%s1827_s1 + $0x68] sm:$0xff]  ;;  %v257_v18 = vpack.c.bf16 %v1143_v12, %v1143_v12  ;;  %v1165_v22 = vld [vmem:[%s1826_s0 + $0x18] sm:$0xff]  ;;  %v186_v23 = vld [vmem:[%s1827_s1 + $0x1f0] sm:$0xff]  ;;  %v277_v28 = vpack.c.bf16 %v155_v21, %v154_v20 }
  0x15   :  { %811 = vmatpush3.bf16.msra.mxu0 %v266_v62  ;;  %v169_v17 = vld [vmem:[%s1827_s1 + $0x168] sm:$0xff]  ;;  %v187_v24 = vld [vmem:[%s1827_s1 + $0x1f8] sm:$0xff]  ;;  %v259_v25 = vpack.c.bf16 %v1165_v22, %v1165_v22  ;;  %v268_v26 = vpack.c.bf16 %v137_v15, %v136_v11  ;;  %v138_v29 = vld [vmem:[%s1827_s1 + $0x70] sm:$0xff] }
  0x16   :  { %812 = vmatprep.subr.bf16.mxu0 %v275_v0  ;;  %342 = vmatprep.mubr.bf16.mxu0 %v257_v18  ;;  %v284_v27 = vpack.c.bf16 %v169_v17, %v168_v16  ;;  %v139_v30 = vld [vmem:[%s1827_s1 + $0x78] sm:$0xff]  ;;  %v170_v31 = vld [vmem:[%s1827_s1 + $0x170] sm:$0xff]  ;;  %v293_v32 = vpack.c.bf16 %v187_v24, %v186_v23  ;;  %v204_v34 = vld [vmem:[%s1827_s1 + $0x280] sm:$0xff] }
  0x17   :  { %833 = vmatpush3.bf16.msra.mxu1 %v282_v63  ;;  %v171_v33 = vld [vmem:[%s1827_s1 + $0x178] sm:$0xff]  ;;  %v205_v35 = vld [vmem:[%s1827_s1 + $0x288] sm:$0xff]  ;;  %382 = vmatprep.mubr.bf16.mxu1 %v259_v25  ;;  %v269_v36 = vpack.c.bf16 %v139_v30, %v138_v29  ;;  %v1196_v37 = vld [vmem:[%s1826_s0] sm:$0xff] }
  0x18   :  { %834 = vmatprep.subr.bf16.mxu1 %v291_v4  ;;  %v285_v38 = vpack.c.bf16 %v171_v33, %v170_v31  ;;  %v302_v39 = vpack.c.bf16 %v205_v35, %v204_v34  ;;  %v188_v40 = vld [vmem:[%s1827_s1 + $0x200] sm:$0xff]  ;;  %v189_v41 = vld [vmem:[%s1827_s1 + $0x208] sm:$0xff]  ;;  %v1207_v42 = vld [vmem:[%s1826_s0 + $0x10] sm:$0xff]  ;;  %v256_v45 = vpack.c.bf16 %v1196_v37, %v1196_v37 }
  0x19   :  { %813 = vmatpush3.bf16.msra.mxu0 %v267_v10  ;;  %v206_v43 = vld [vmem:[%s1827_s1 + $0x290] sm:$0xff]  ;;  %v207_v44 = vld [vmem:[%s1827_s1 + $0x298] sm:$0xff]  ;;  %v294_v46 = vpack.c.bf16 %v189_v41, %v188_v40  ;;  %v258_v47 = vpack.c.bf16 %v1207_v42, %v1207_v42  ;;  %v1228_v51 = vld [vmem:[%s1826_s0 + $0x28] sm:$0xff] }
  0x1a   :  { %814 = vmatprep.subr.bf16.mxu0 %v276_v14  ;;  %v303_v48 = vpack.c.bf16 %v207_v44, %v206_v43  ;;  %v190_v49 = vld [vmem:[%s1827_s1 + $0x210] sm:$0xff]  ;;  %v191_v50 = vld [vmem:[%s1827_s1 + $0x218] sm:$0xff]  ;;  %v208_v52 = vld [vmem:[%s1827_s1 + $0x2a0] sm:$0xff]  ;;  %v261_v54 = vpack.c.bf16 %v1228_v51, %v1228_v51 }
  0x1b   :  { %835 = vmatpush3.bf16.msra.mxu1 %v283_v13  ;;  %v209_v53 = vld [vmem:[%s1827_s1 + $0x2a8] sm:$0xff] }
  0x1c   :  { %836 = vmatprep.subr.bf16.mxu1 %v292_v19 }
  0x1d   :  { %815 = vmatpush3.bf16.msra.mxu0 %v268_v26 }
  0x1e   :  { %816 = vmatprep.subr.bf16.mxu0 %v277_v28 }
  0x1f   :  { %837 = vmatpush3.bf16.msra.mxu1 %v284_v27 }
  0x20   :  { %838 = vmatprep.subr.bf16.mxu1 %v293_v32 }
  0x21   :  { %817 = vmatpush3.bf16.msra.mxu0 %v269_v36 }
  0x22   :  { %846 = vmatprep.subr.bf16.mxu0 %v302_v39 }
  0x23   :  { %839 = vmatpush3.bf16.msra.mxu1 %v285_v38 }
  0x24   :  { %10 = vsyncpa [#allocation3], 0  ;;  %343 = vmatmul.mubr.bf16.vlgmr.msra.gmra.mrb[0].mxu0 %v256_v45  ;;  %v295_v55 = vpack.c.bf16 %v191_v50, %v190_v49  ;;  %v304_v56 = vpack.c.bf16 %v209_v53, %v208_v52  ;;  %v192_v57 = vld [vmem:[%s1827_s1 + $0x220] sm:$0xff]  ;;  %v193_v58 = vld [vmem:[%s1827_s1 + $0x228] sm:$0xff]  ;;  %v952_v33 = vmov 0.0   ;;  %vm953_vm0 = vmmov 0  }
  0x25   :  { %847 = vmatpush3.bf16.msra.mxu0 %v294_v46  ;;  %422 = vmatprep.mubr.bf16.mxu0 %v261_v54  ;;  %v210_v59 = vld [vmem:[%s1827_s1 + $0x2b0] sm:$0xff]  ;;  %v211_v60 = vld [vmem:[%s1827_s1 + $0x2b8] sm:$0xff]  ;;  %v296_v61 = vpack.c.bf16 %v193_v58, %v192_v57  ;;  %v212_v1 = vld [vmem:[%s1827_s1 + $0x2c0] sm:$0xff]  ;;  %s940_s13 = scalar_lea.hbm %s1828_s2, 16 }
  0x26   :  { %383 = vmatmul.mubr.bf16.vlgmr.msra.gmra.mrb[0].mxu1 %v258_v47  ;;  %848 = vmatprep.subr.bf16.mxu0 %v303_v48  ;;  %v305_v62 = vpack.c.bf16 %v211_v60, %v210_v59  ;;  %v194_v63 = vld [vmem:[%s1827_s1 + $0x230] sm:$0xff]  ;;  %v195_v0 = vld [vmem:[%s1827_s1 + $0x238] sm:$0xff]  ;;  %v213_v2 = vld [vmem:[%s1827_s1 + $0x2c8] sm:$0xff]  ;;  %p941_p0 = scmp.ne.s32.totalorder %s1828_s2, %s940_s13  ;;  %p944_p1 = scmp.lt.u32.totalorder %s940_s13, %s1828_s2 }
  0x27   :  { %v297_v3 = vpack.c.bf16 %v195_v0, %v194_v63  ;;  %v306_v4 = vpack.c.bf16 %v213_v2, %v212_v1  ;;  %v196_v5 = vld [vmem:[%s1827_s1 + $0x240] sm:$0xff]  ;;  %v197_v6 = vld [vmem:[%s1827_s1 + $0x248] sm:$0xff]  ;;  %v214_v7 = vld [vmem:[%s1827_s1 + $0x2d0] sm:$0xff]  ;;  %886 = vmatprep.subr.bf16.mxu1 %v952_v33  ;;  %902 = vmatprep.mubr.msk.bf16.mxu1 %vm953_vm0, %v952_v33 }
  0x28   :  { %v215_v8 = vld [vmem:[%s1827_s1 + $0x2d8] sm:$0xff]  ;;  %v298_v9 = vpack.c.bf16 %v197_v6, %v196_v5  ;;  %v198_v11 = vld [vmem:[%s1827_s1 + $0x250] sm:$0xff]  ;;  %v216_v14 = vld [vmem:[%s1827_s1 + $0x2e0] sm:$0xff]  ;;  %p946_p2 = pnand %p944_p1, %p941_p0 }
  0x29   :  { %849 = vmatpush3.bf16.msra.mxu0 %v295_v55  ;;  %v307_v10 = vpack.c.bf16 %v215_v8, %v214_v7  ;;  %v199_v13 = vld [vmem:[%s1827_s1 + $0x258] sm:$0xff]  ;;  %v217_v15 = vld [vmem:[%s1827_s1 + $0x2e8] sm:$0xff]  ;;  %v200_v18 = vld [vmem:[%s1827_s1 + $0x260] sm:$0xff] }
  0x2a   :  { %850 = vmatprep.subr.bf16.mxu0 %v304_v56  ;;  %v299_v16 = vpack.c.bf16 %v199_v13, %v198_v11  ;;  %v308_v17 = vpack.c.bf16 %v217_v15, %v216_v14  ;;  %v201_v19 = vld [vmem:[%s1827_s1 + $0x268] sm:$0xff]  ;;  %v218_v20 = vld [vmem:[%s1827_s1 + $0x2f0] sm:$0xff]  ;;  %v219_v21 = vld [vmem:[%s1827_s1 + $0x2f8] sm:$0xff] }
  0x2b   :  { %v300_v23 = vpack.c.bf16 %v201_v19, %v200_v18  ;;  %v309_v24 = vpack.c.bf16 %v219_v21, %v218_v20  ;;  %v202_v25 = vld [vmem:[%s1827_s1 + $0x270] sm:$0xff]  ;;  %v203_v26 = vld [vmem:[%s1827_s1 + $0x278] sm:$0xff]  ;;  %v1307_v28 = vld [vmem:[%s1826_s0 + $0x20] sm:$0xff] }
  0x2c   :  { %v301_v27 = vpack.c.bf16 %v203_v26, %v202_v25  ;;  %v260_v29 = vpack.c.bf16 %v1307_v28, %v1307_v28  ;;  %v221_v30 = vld [vmem:[%s1827_s1 + $0x308] sm:$0xff]  ;;  %v222_v31 = vld [vmem:[%s1827_s1 + $0x310] sm:$0xff]  ;;  %v223_v32 = vld [vmem:[%s1827_s1 + $0x318] sm:$0xff] }
  0x2d   :  { %851 = vmatpush3.bf16.msra.mxu0 %v296_v61  ;;  %v432_v34 = vpack.c.bf16 %v222_v31, %v221_v30  ;;  %v224_v35 = vld [vmem:[%s1827_s1 + $0x320] sm:$0xff]  ;;  %v225_v38 = vld [vmem:[%s1827_s1 + $0x328] sm:$0xff]  ;;  %v226_v39 = vld [vmem:[%s1827_s1 + $0x330] sm:$0xff] }
  0x2e   :  { %852 = vmatprep.subr.bf16.mxu0 %v305_v62  ;;  %v433_v36 = vpack.c.bf16 %v224_v35, %v223_v32  ;;  %v434_v40 = vpack.c.bf16 %v226_v39, %v225_v38  ;;  %v227_v41 = vld [vmem:[%s1827_s1 + $0x338] sm:$0xff]  ;;  %v228_v43 = vld [vmem:[%s1827_s1 + $0x340] sm:$0xff]  ;;  %v229_v45 = vld [vmem:[%s1827_s1 + $0x348] sm:$0xff] }
  0x2f   :  { %887 = vmatpush3.bf16.msra.mxu1 %v432_v34  ;;  %v435_v44 = vpack.c.bf16 %v228_v43, %v227_v41  ;;  %v230_v46 = vld [vmem:[%s1827_s1 + $0x350] sm:$0xff]  ;;  %v231_v48 = vld [vmem:[%s1827_s1 + $0x358] sm:$0xff]  ;;  %v232_v49 = vld [vmem:[%s1827_s1 + $0x360] sm:$0xff] }
  0x30   :  { %888 = vmatprep.subr.bf16.mxu1 %v952_v33  ;;  %v436_v47 = vpack.c.bf16 %v230_v46, %v229_v45  ;;  %v437_v50 = vpack.c.bf16 %v232_v49, %v231_v48  ;;  %v233_v52 = vld [vmem:[%s1827_s1 + $0x368] sm:$0xff]  ;;  %v234_v53 = vld [vmem:[%s1827_s1 + $0x370] sm:$0xff]  ;;  %v235_v55 = vld [vmem:[%s1827_s1 + $0x378] sm:$0xff] }
  0x31   :  { %853 = vmatpush3.bf16.msra.mxu0 %v297_v3  ;;  %v438_v54 = vpack.c.bf16 %v234_v53, %v233_v52  ;;  %v236_v56 = vld [vmem:[%s1827_s1 + $0x380] sm:$0xff]  ;;  %v237_v20 = vld [vmem:[%s1827_s1 + $0x388] sm:$0xff]  ;;  %v238_v31 = vld [vmem:[%s1827_s1 + $0x390] sm:$0xff] }
  0x32   :  { %854 = vmatprep.subr.bf16.mxu0 %v306_v4  ;;  %v439_v57 = vpack.c.bf16 %v236_v56, %v235_v55  ;;  %v220_v59 = vld [vmem:[%s1827_s1 + $0x300] sm:$0xff]  ;;  %v239_v32 = vld [vmem:[%s1827_s1 + $0x398] sm:$0xff]  ;;  %v242_v39 = vld [vmem:[%s1827_s1 + $0x3b0] sm:$0xff] }
  0x33   :  { %889 = vmatpush3.bf16.msra.mxu1 %v433_v36  ;;  %v240_v34 = vld [vmem:[%s1827_s1 + $0x3a0] sm:$0xff]  ;;  %v506_v35 = vpack.c.bf16 %v239_v32, %v238_v31  ;;  %v241_v36 = vld [vmem:[%s1827_s1 + $0x3a8] sm:$0xff]  ;;  %v246_v52 = vld [vmem:[%s1827_s1 + $0x3d0] sm:$0xff] }
  0x34   :  { %890 = vmatprep.subr.bf16.mxu1 %v952_v33  ;;  %v507_v38 = vpack.c.bf16 %v241_v36, %v240_v34  ;;  %v244_v43 = vld [vmem:[%s1827_s1 + $0x3c0] sm:$0xff]  ;;  %v247_v53 = vld [vmem:[%s1827_s1 + $0x3d8] sm:$0xff]  ;;  %v249_v56 = vld [vmem:[%s1827_s1 + $0x3e8] sm:$0xff] }
  0x35   :  { %855 = vmatpush3.bf16.msra.mxu0 %v298_v9  ;;  %v248_v55 = vld [vmem:[%s1827_s1 + $0x3e0] sm:$0xff]  ;;  %v42_v34 = vld [vmem:[%s1826_s0 + $0xd0] sm:$0xff]  ;;  %v53_v36 = vld [vmem:[%s1826_s0 + $0x128] sm:$0xff] }
  0x36   :  { %856 = vmatprep.subr.bf16.mxu0 %v307_v10  ;;  %v36_v31 = vld [vmem:[%s1826_s0 + $0xa0] sm:$0xff] }
  0x37   :  { %891 = vmatpush3.bf16.msra.mxu1 %v434_v40  ;;  %v243_v40 = vld [vmem:[%s1827_s1 + $0x3b8] sm:$0xff] }
  0x38   :  { %892 = vmatprep.subr.bf16.mxu1 %v952_v33  ;;  %v508_v41 = vpack.c.bf16 %v243_v40, %v242_v39  ;;  %v46_v40 = vld [vmem:[%s1826_s0 + $0xf0] sm:$0xff] }
  0x39   :  { %857 = vmatpush3.bf16.msra.mxu0 %v299_v16  ;;  %v480_v16 = vlaneseq }
  0x3a   :  { %858 = vmatprep.subr.bf16.mxu0 %v308_v17 }
  0x3b   :  { %893 = vmatpush3.bf16.msra.mxu1 %v435_v44  ;;  %v1373_v17 = vshrl.u32 %v480_v16, 7  ;;  %v1375_v18 = vand.u32 127, %v480_v16  ;;  %v245_v44 = vld [vmem:[%s1827_s1 + $0x3c8] sm:$0xff]  ;;  %v24_v16 = vld [vmem:[%s1826_s0 + $0x40] sm:$0xff] }
  0x3c   :  { %894 = vmatprep.subr.bf16.mxu1 %v952_v33  ;;  %v509_v45 = vpack.c.bf16 %v245_v44, %v244_v43  ;;  %v49_v43 = vld [vmem:[%s1826_s0 + $0x108] sm:$0xff]  ;;  %v55_v44 = vld [vmem:[%s1826_s0 + $0x138] sm:$0xff] }
  0x3d   :  { %859 = vmatpush3.bf16.msra.mxu0 %v300_v23  ;;  %v801_v19 = vadd.s32 4294967294, %v1373_v17  ;;  %v255_v23 = vld [vmem:[%s1827_s1 + $0x418] sm:$0xff]  ;;  %vm484_vm2 = vcmp.lt.s32.totalorder %v1375_v18, 4  ;;  %vm497_vm3 = vcmp.ge.s32.totalorder %v1373_v17, 2  ;;  %vm503_vm6 = vcmp.lt.s32.totalorder %v1373_v17, 2 }
  0x3e   :  { %860 = vmatprep.subr.bf16.mxu0 %v309_v24  ;;  %vm498_vm4 = vmand %vm497_vm3, %vm484_vm2 }
  0x3f   :  { %895 = vmatpush3.bf16.msra.mxu1 %v436_v47  ;;  %vm500_vm1 = vcmp.eq.s32.totalorder %v1375_v18, %v801_v19  ;;  %v30_v19 = vld [vmem:[%s1826_s0 + $0x70] sm:$0xff] }
  0x40   :  { %896 = vmatprep.subr.bf16.mxu1 %v952_v33  ;;  %vm501_vm5 = vmand %vm498_vm4, %vm500_vm1 }
  0x41   :  { %861 = vmatpush3.bf16.msra.mxu0 %v301_v27 }
  0x42   :  { %906 = vmatprep.subr.bf16.mxu0 %v952_v33 }
  0x43   :  { %897 = vmatpush3.bf16.msra.mxu1 %v437_v50 }
  0x44   :  { %423 = vmatmul.mubr.bf16.vlgmr.msra.gmra.mrb[4].mxu0 %v260_v29  ;;  %898 = vmatprep.subr.bf16.mxu1 %v952_v33 }
  0x45   :  { %922 = vmatprep.mubr.msk.bf16.mxu0 %vm953_vm0, %v952_v33  ;;  %907 = vmatpush3.bf16.msra.mxu0 %v506_v35  ;;  %v47_v35 = vld [vmem:[%s1826_s0 + $0xf8] sm:$0xff] }
  0x46   :  { %908 = vmatprep.subr.bf16.mxu0 %v952_v33  ;;  %v569_v39 = vpack.c.bf16 %v53_v36, %v47_v35  ;;  %v100_v35 = vld [vmem:[%s1826_s0 + $0x2a0] sm:$0xff] }
  0x47   :  { %899 = vmatpush3.bf16.msra.mxu1 %v438_v54  ;;  %v510_v54 = vpack.c.bf16 %v247_v53, %v246_v52  ;;  %v58_v52 = vld [vmem:[%s1826_s0 + $0x150] sm:$0xff] }
  0x48   :  { %900 = vmatprep.subr.bf16.mxu1 %v952_v33 }
  0x49   :  { %909 = vmatpush3.bf16.msra.mxu0 %v507_v38  ;;  %v564_v38 = vpack.c.bf16 %v42_v34, %v36_v31  ;;  %v94_v34 = vld [vmem:[%s1826_s0 + $0x270] sm:$0xff] }
  0x4a   :  { %910 = vmatprep.subr.bf16.mxu0 %v952_v33 }
  0x4b   :  { %901 = vmatpush3.bf16.msra.mxu1 %v439_v57  ;;  %v511_v57 = vpack.c.bf16 %v249_v56, %v248_v55  ;;  %v64_v55 = vld [vmem:[%s1826_s0 + $0x180] sm:$0xff]  ;;  %v61_v56 = vld [vmem:[%s1826_s0 + $0x168] sm:$0xff] }
  0x4d   :  { %911 = vmatpush3.bf16.msra.mxu0 %v508_v41  ;;  %v52_v41 = vld [vmem:[%s1826_s0 + $0x120] sm:$0xff] }
  0x4e   :  { %912 = vmatprep.subr.bf16.mxu0 %v952_v33 }
  0x51   :  { %913 = vmatpush3.bf16.msra.mxu0 %v509_v45  ;;  %v48_v45 = vld [vmem:[%s1826_s0 + $0x100] sm:$0xff] }
  0x52   :  { %914 = vmatprep.subr.bf16.mxu0 %v952_v33 }
  0x55   :  { %915 = vmatpush3.bf16.msra.mxu0 %v510_v54 }
  0x56   :  { %916 = vmatprep.subr.bf16.mxu0 %v952_v33 }
  0x59   :  { %917 = vmatpush3.bf16.msra.mxu0 %v511_v57  ;;  %v67_v57 = vld [vmem:[%s1826_s0 + $0x198] sm:$0xff] }
  0x5a   :  { %918 = vmatprep.subr.bf16.mxu0 %v952_v33 }
  0xf7   :  { %v818_v58 = vpop.f32.mrb[0].mxu0 }
  0xf8   :  { %v819_v60 = vpop.f32.mrb[1].mxu0 }
  0xf9   :  { %v840_v61 = vpop.f32.mrb[0].mxu1  ;;  %v820_v62 = vadd.f32 %v819_v60, %v818_v58  ;;  %v821_v63 = vpop.f32.mrb[2].mxu0  ;;  %v250_v58 = vld [vmem:[%s1827_s1 + $0x3f0] sm:$0xff] }
  0xfa   :  { %v841_v0 = vpop.f32.mrb[1].mxu1  ;;  %v822_v1 = vpop.f32.mrb[3].mxu0 }
  0xfb   :  { %v842_v2 = vadd.f32 %v841_v0, %v840_v61  ;;  %v843_v3 = vpop.f32.mrb[2].mxu1  ;;  %v345_v4 = vadd.f32 %v820_v62, %v220_v59  ;;  %v251_v59 = vld [vmem:[%s1827_s1 + $0x3f8] sm:$0xff]  ;;  %v252_v61 = vld [vmem:[%s1827_s1 + $0x400] sm:$0xff]  ;;  %v253_v62 = vld [vmem:[%s1827_s1 + $0x408] sm:$0xff] }
  0xfc   :  { %v844_v5 = vpop.f32.mrb[3].mxu1  ;;  %v512_v60 = vpack.c.bf16 %v251_v59, %v250_v58  ;;  %v513_v63 = vpack.c.bf16 %v253_v62, %v252_v61  ;;  %v577_v58 = vpack.c.bf16 %v67_v57, %v61_v56  ;;  %v60_v59 = vld [vmem:[%s1826_s0 + $0x160] sm:$0xff]  ;;  %v71_v61 = vld [vmem:[%s1826_s0 + $0x1b8] sm:$0xff]  ;;  %v77_v62 = vld [vmem:[%s1826_s0 + $0x1e8] sm:$0xff] }
  0xfd   :  { %v385_v6 = vadd.f32 %v842_v2, %v345_v4  ;;  %v502_v2 = vsel %vm501_vm5, 1.0, %v952_v33  ;;  %v27_v56 = vld [vmem:[%s1826_s0 + $0x58] sm:$0xff]  ;;  %v33_v57 = vld [vmem:[%s1826_s0 + $0x88] sm:$0xff] }
  0xfe   :  { %919 = vmatpush3.bf16.msra.mxu0 %v512_v60  ;;  %v66_v60 = vld [vmem:[%s1826_s0 + $0x190] sm:$0xff] }
  0xff   :  { %920 = vmatprep.subr.bf16.mxu0 %v952_v33  ;;  %v29_v33 = vld [vmem:[%s1826_s0 + $0x68] sm:$0xff] }
 0x102   :  { %921 = vmatpush3.bf16.msra.mxu0 %v513_v63  ;;  %v574_v63 = vpack.c.bf16 %v64_v55, %v58_v52  ;;  %v108_v52 = vld [vmem:[%s1826_s0 + $0x2e0] sm:$0xff] }
 0x117   :  { %v862_v7 = vpop.f32.mrb[4].mxu0 }
 0x118   :  { %v863_v8 = vpop.f32.mrb[5].mxu0 }
 0x119   :  { %v864_v9 = vadd.f32 %v863_v8, %v862_v7  ;;  %v865_v10 = vpop.f32.mrb[6].mxu0  ;;  %v23_v7 = vld [vmem:[%s1826_s0 + $0x38] sm:$0xff]  ;;  %v22_v8 = vld [vmem:[%s1826_s0 + $0x30] sm:$0xff] }
 0x11a   :  { %v866_v11 = vpop.f32.mrb[7].mxu0  ;;  %v28_v10 = vld [vmem:[%s1826_s0 + $0x60] sm:$0xff] }
 0x11b   :  { %v425_v13 = vadd.f32 %v864_v9, %v385_v6  ;;  %v557_v9 = vpack.c.bf16 %v29_v33, %v23_v7  ;;  %v25_v11 = vld [vmem:[%s1826_s0 + $0x48] sm:$0xff]  ;;  %v72_v7 = vld [vmem:[%s1826_s0 + $0x1c0] sm:$0xff] }
 0x11d   :  { %v430_v14 = vmax.f32 %v425_v13, 0.0  ;;  %v31_v13 = vld [vmem:[%s1826_s0 + $0x78] sm:$0xff]  ;;  %604 = vmatprep.subr.bf16.mxu1 %v557_v9 }
 0x11e   :  { %v83_v9 = vld [vmem:[%s1826_s0 + $0x218] sm:$0xff] }
 0x11f   :  { %v431_v15 = vpack.c.bf16 %v430_v14, %v430_v14  ;;  %v556_v14 = vpack.c.bf16 %v28_v10, %v22_v8  ;;  %v78_v8 = vld [vmem:[%s1826_s0 + $0x1f0] sm:$0xff]  ;;  %v89_v10 = vld [vmem:[%s1826_s0 + $0x248] sm:$0xff] }
 0x121   :  { %903 = vmatmul.mubr.bf16.vlgmr.msra.gmra.mrb[4].mxu1 %v431_v15  ;;  %v559_v15 = vpack.c.bf16 %v31_v13, %v25_v11  ;;  %v85_v11 = vld [vmem:[%s1826_s0 + $0x228] sm:$0xff]  ;;  %v91_v13 = vld [vmem:[%s1826_s0 + $0x258] sm:$0xff] }
 0x122   :  { %605 = vmatpush1.bf16.msra.mxu1 %v556_v14 }
 0x123   :  { %645 = vmatprep.subr.bf16.mxu0 %v559_v15  ;;  %v582_v15 = vpack.c.bf16 %v78_v8, %v72_v7  ;;  %v39_v7 = vld [vmem:[%s1826_s0 + $0xb8] sm:$0xff] }
 0x1f4   :  { %v474_v21 = vpop.f32.mrb[4].mxu1 }
 0x1f5   :  { %v475_v24 = vadd.f32 %v474_v21, %v237_v20  ;;  %v904_v25 = vpop.f32.mrb[5].mxu1  ;;  %v35_v20 = vld [vmem:[%s1826_s0 + $0x98] sm:$0xff]  ;;  %v558_v21 = vpack.c.bf16 %v30_v19, %v24_v16  ;;  %v587_v16 = vpack.c.bf16 %v89_v10, %v83_v9  ;;  %v82_v19 = vld [vmem:[%s1826_s0 + $0x210] sm:$0xff] }
 0x1f6   :  { %v477_v26 = vpop.f32.mrb[6].mxu1  ;;  %v40_v25 = vld [vmem:[%s1826_s0 + $0xc0] sm:$0xff] }
 0x1f7   :  { %v905_v27 = vpop.f32.mrb[7].mxu1  ;;  %v485_v29 = vadd.f32 %v475_v24, %v255_v23  ;;  %v41_v23 = vld [vmem:[%s1826_s0 + $0xc8] sm:$0xff]  ;;  %v34_v24 = vld [vmem:[%s1826_s0 + $0x90] sm:$0xff] }
 0x1f8   :  { %v563_v26 = vpack.c.bf16 %v41_v23, %v35_v20  ;;  %v562_v27 = vpack.c.bf16 %v40_v25, %v34_v24  ;;  %v88_v20 = vld [vmem:[%s1826_s0 + $0x240] sm:$0xff]  ;;  %v589_v23 = vpack.c.bf16 %v91_v13, %v85_v11  ;;  %v90_v24 = vld [vmem:[%s1826_s0 + $0x250] sm:$0xff]  ;;  %v95_v25 = vld [vmem:[%s1826_s0 + $0x278] sm:$0xff] }
 0x1f9   :  { %v486_v30 = vsel %vm484_vm2, %v485_v29, -1e+30  ;;  %v37_v29 = vld [vmem:[%s1826_s0 + $0xa8] sm:$0xff] }
 0x1fa   :  { %487 = vmax.xlane.f32.xlu0 %v486_v30  ;;  %606 = vmatprep.subr.bf16.mxu1 %v563_v26  ;;  %v101_v26 = vld [vmem:[%s1826_s0 + $0x2a8] sm:$0xff] }
 0x1fb   :  { %607 = vmatpush1.bf16.msra.mxu1 %v562_v27  ;;  %v97_v27 = vld [vmem:[%s1826_s0 + $0x288] sm:$0xff] }
 0x1fc   :  { %608 = vmatprep.subr.bf16.mxu1 %v569_v39  ;;  %v96_v39 = vld [vmem:[%s1826_s0 + $0x280] sm:$0xff] }
 0x287   :  { %v488_v46 = vpop.xlane.xlu0 %487 }
 0x288   :  { %v489_v47 = vsub.f32 %v486_v30, %v488_v46  ;;  %v43_v30 = vld [vmem:[%s1826_s0 + $0xd8] sm:$0xff]  ;;  %v54_v46 = vld [vmem:[%s1826_s0 + $0x130] sm:$0xff] }
 0x289   :  { %v565_v32 = vpack.c.bf16 %v43_v30, %v37_v29  ;;  %v570_v53 = vpack.c.bf16 %v54_v46, %v48_v45  ;;  %v103_v29 = vld [vmem:[%s1826_s0 + $0x2b8] sm:$0xff]  ;;  %v586_v30 = vpack.c.bf16 %v88_v20, %v82_v19  ;;  %v106_v46 = vld [vmem:[%s1826_s0 + $0x2d0] sm:$0xff]  ;;  %v57_v19 = vld [vmem:[%s1826_s0 + $0x148] sm:$0xff] }
 0x28a   :  { %v490_v48 = vmul.f32 1.442695, %v489_v47  ;;  %v568_v47 = vpack.c.bf16 %v52_v41, %v46_v40  ;;  %v595_v36 = vpack.c.bf16 %v103_v29, %v97_v27  ;;  %v102_v40 = vld [vmem:[%s1826_s0 + $0x2b0] sm:$0xff] }
 0x28b   :  { %v594_v41 = vpack.c.bf16 %v102_v40, %v96_v39  ;;  %v80_v39 = vld [vmem:[%s1826_s0 + $0x200] sm:$0xff]  ;;  %v87_v40 = vld [vmem:[%s1826_s0 + $0x238] sm:$0xff] }
 0x28c   :  { %932 = vpow2.f32 %v490_v48  ;;  %v571_v48 = vpack.c.bf16 %v55_v44, %v49_v43  ;;  %609 = vmatpush1.bf16.msra.mxu1 %v568_v47  ;;  %v107_v43 = vld [vmem:[%s1826_s0 + $0x2d8] sm:$0xff]  ;;  %v113_v44 = vld [vmem:[%s1826_s0 + $0x308] sm:$0xff]  ;;  %v112_v47 = vld [vmem:[%s1826_s0 + $0x300] sm:$0xff] }
 0x28d   :  { %v599_v45 = vpack.c.bf16 %v113_v44, %v107_v43 }
 0x296   :  { %v933_v49 = vpop.eup %932 }
 0x297   :  { %v492_v50 = vsel %vm484_vm2, %v933_v49, 0.0  ;;  %v59_v49 = vld [vmem:[%s1826_s0 + $0x158] sm:$0xff] }
 0x298   :  { %493 = vadd.xlane.f32.xlu0 %v492_v50 }
 0x325   :  { %v494_v0 = vpop.xlane.xlu0 %493 }
 0x326   :  { %934 = vrcp.f32 %v494_v0  ;;  %v73_v0 = vld [vmem:[%s1826_s0 + $0x1c8] sm:$0xff] }
 0x330   :  { %v935_v1 = vpop.eup %934 }
 0x331   :  { %v496_v3 = vmul.f32 %v935_v1, %v492_v50  ;;  %v65_v50 = vld [vmem:[%s1826_s0 + $0x188] sm:$0xff]  ;;  %v79_v1 = vld [vmem:[%s1826_s0 + $0x1f8] sm:$0xff] }
 0x332   :  { %v575_v54 = vpack.c.bf16 %v65_v50, %v59_v49  ;;  %v583_v33 = vpack.c.bf16 %v79_v1, %v73_v0  ;;  %v598_v49 = vpack.c.bf16 %v112_v47, %v106_v46  ;;  %v115_v50 = vld [vmem:[%s1826_s0 + $0x318] sm:$0xff]  ;;  %v254_v1 = vld [vmem:[%s1827_s1 + $0x410] sm:$0xff]  ;;  %v92_v46 = vld [vmem:[%s1826_s0 + $0x260] sm:$0xff] }
 0x333   :  { %v1454_v4 = vsel %vm484_vm2, %v496_v3, -1e+30  ;;  %v504_v5 = vsel %vm503_vm6, %v496_v3, %v502_v2  ;;  %v576_v2 = vpack.c.bf16 %v66_v60, %v60_v59  ;;  %v581_v3 = vpack.c.bf16 %v77_v62, %v71_v61  ;;  %v99_v47 = vld [vmem:[%s1826_s0 + $0x298] sm:$0xff] }
 0x334   :  { %769 = vmax.xlane.f32.xlu1 %v1454_v4  ;;  %v505_v6 = vpack.c.bf16 %v504_v5, %v504_v5  ;;  %610 = vmatprep.subr.bf16.mxu1 %v575_v54  ;;  %v70_v5 = vld [vmem:[%s1826_s0 + $0x1b0] sm:$0xff]  ;;  %v954_v59 = vmov 0  }
 0x335   :  { %611 = vmatpush1.bf16.msra.mxu1 %v574_v63  ;;  %636 = vmatprep.mubr.bf16.mxu1 %v954_v59 }
 0x336   :  { %923 = vmatmul.mubr.bf16.vlgmr.msra.gmra.mrb[8].mxu0 %v505_v6  ;;  %v76_v6 = vld [vmem:[%s1826_s0 + $0x1e0] sm:$0xff]  ;;  %612 = vmatprep.subr.bf16.mxu1 %v581_v3 }
 0x337   :  { %646 = vmatpush1.bf16.msra.mxu0 %v558_v21  ;;  %v580_v14 = vpack.c.bf16 %v76_v6, %v70_v5  ;;  %v84_v21 = vld [vmem:[%s1826_s0 + $0x220] sm:$0xff]  ;;  %677 = vmatprep.mubr.bf16.mxu0 %v954_v59 }
 0x338   :  { %647 = vmatprep.subr.bf16.mxu0 %v565_v32  ;;  %v588_v31 = vpack.c.bf16 %v90_v24, %v84_v21  ;;  %v593_v32 = vpack.c.bf16 %v101_v26, %v95_v25  ;;  %v32_v6 = vld [vmem:[%s1826_s0 + $0x80] sm:$0xff]  ;;  %v63_v25 = vld [vmem:[%s1826_s0 + $0x178] sm:$0xff]  ;;  %v69_v26 = vld [vmem:[%s1826_s0 + $0x1a8] sm:$0xff] }
 0x339   :  { %613 = vmatpush1.bf16.msra.mxu1 %v580_v14  ;;  %v38_v14 = vld [vmem:[%s1826_s0 + $0xb0] sm:$0xff]  ;;  %v56_v24 = vld [vmem:[%s1826_s0 + $0x140] sm:$0xff]  ;;  %v579_v29 = vpack.c.bf16 %v69_v26, %v63_v25 }
 0x33a   :  { %614 = vmatprep.subr.bf16.mxu1 %v587_v16  ;;  %v51_v16 = vld [vmem:[%s1826_s0 + $0x118] sm:$0xff] }
 0x33b   :  { %648 = vmatpush1.bf16.msra.mxu0 %v564_v38  ;;  %v592_v38 = vpack.c.bf16 %v100_v35, %v94_v34  ;;  %v573_v21 = vpack.c.bf16 %v57_v19, %v51_v16  ;;  %v81_v34 = vld [vmem:[%s1826_s0 + $0x208] sm:$0xff] }
 0x33c   :  { %649 = vmatprep.subr.bf16.mxu0 %v571_v48  ;;  %v109_v48 = vld [vmem:[%s1826_s0 + $0x2e8] sm:$0xff] }
 0x33d   :  { %615 = vmatpush1.bf16.msra.mxu1 %v586_v30  ;;  %v601_v54 = vpack.c.bf16 %v115_v50, %v109_v48  ;;  %v62_v30 = vld [vmem:[%s1826_s0 + $0x170] sm:$0xff]  ;;  %v105_v48 = vld [vmem:[%s1826_s0 + $0x2c8] sm:$0xff] }
 0x33e   :  { %616 = vmatprep.subr.bf16.mxu1 %v593_v32  ;;  %v75_v32 = vld [vmem:[%s1826_s0 + $0x1d8] sm:$0xff]  ;;  %v597_v50 = vpack.c.bf16 %v105_v48, %v99_v47 }
 0x33f   :  { %650 = vmatpush1.bf16.msra.mxu0 %v570_v53  ;;  %v114_v53 = vld [vmem:[%s1826_s0 + $0x310] sm:$0xff] }
 0x340   :  { %651 = vmatprep.subr.bf16.mxu0 %v577_v58  ;;  %v600_v55 = vpack.c.bf16 %v114_v53, %v108_v52  ;;  %v561_v58 = vpack.c.bf16 %v33_v57, %v27_v56  ;;  %v98_v52 = vld [vmem:[%s1826_s0 + $0x290] sm:$0xff]  ;;  %v104_v53 = vld [vmem:[%s1826_s0 + $0x2c0] sm:$0xff] }
 0x341   :  { %617 = vmatpush1.bf16.msra.mxu1 %v592_v38  ;;  %v74_v38 = vld [vmem:[%s1826_s0 + $0x1d0] sm:$0xff]  ;;  %v596_v56 = vpack.c.bf16 %v104_v53, %v98_v52 }
 0x342   :  { %618 = vmatprep.subr.bf16.mxu1 %v599_v45  ;;  %v584_v43 = vpack.c.bf16 %v80_v39, %v74_v38  ;;  %v86_v45 = vld [vmem:[%s1826_s0 + $0x230] sm:$0xff] }
 0x343   :  { %652 = vmatpush1.bf16.msra.mxu0 %v576_v2 }
 0x344   :  { %653 = vmatprep.subr.bf16.mxu0 %v583_v33  ;;  %v45_v33 = vld [vmem:[%s1826_s0 + $0xe8] sm:$0xff] }
 0x345   :  { %619 = vmatpush1.bf16.msra.mxu1 %v598_v49  ;;  %v567_v13 = vpack.c.bf16 %v45_v33, %v39_v7  ;;  %v590_v49 = vpack.c.bf16 %v92_v46, %v86_v45 }
 0x346   :  { %686 = vmatprep.subr.bf16.mxu1 %v561_v58  ;;  %v110_v58 = vld [vmem:[%s1826_s0 + $0x2f0] sm:$0xff] }
 0x347   :  { %654 = vmatpush1.bf16.msra.mxu0 %v582_v15  ;;  %v44_v15 = vld [vmem:[%s1826_s0 + $0xe0] sm:$0xff] }
 0x348   :  { %655 = vmatprep.subr.bf16.mxu0 %v589_v23  ;;  %v566_v20 = vpack.c.bf16 %v44_v15, %v38_v14  ;;  %v50_v23 = vld [vmem:[%s1826_s0 + $0x110] sm:$0xff] }
 0x349   :  { %v572_v27 = vpack.c.bf16 %v56_v24, %v50_v23 }
 0x34b   :  { %656 = vmatpush1.bf16.msra.mxu0 %v588_v31  ;;  %v68_v31 = vld [vmem:[%s1826_s0 + $0x1a0] sm:$0xff] }
 0x34c   :  { %657 = vmatprep.subr.bf16.mxu0 %v595_v36  ;;  %v578_v35 = vpack.c.bf16 %v68_v31, %v62_v30  ;;  %v585_v36 = vpack.c.bf16 %v81_v34, %v75_v32  ;;  %v123_v31 = vld [vmem:[%s1826_s0 + $0x358] sm:$0xff] }
 0x34f   :  { %658 = vmatpush1.bf16.msra.mxu0 %v594_v41  ;;  %v93_v41 = vld [vmem:[%s1826_s0 + $0x268] sm:$0xff] }
 0x350   :  { %659 = vmatprep.subr.bf16.mxu0 %v601_v54  ;;  %v591_v44 = vpack.c.bf16 %v93_v41, %v87_v40  ;;  %v111_v54 = vld [vmem:[%s1826_s0 + $0x2f8] sm:$0xff] }
 0x353   :  { %660 = vmatpush1.bf16.msra.mxu0 %v600_v55  ;;  %v117_v55 = vld [vmem:[%s1826_s0 + $0x328] sm:$0xff] }
 0x354   :  { %v603_v57 = vpack.c.bf16 %v117_v55, %v111_v54 }
 0x3c1   :  { %v770_v60 = vpop.xlane.xlu1 %769 }
 0x3c2   :  { %v771_v61 = vsub.f32 %v1454_v4, %v770_v60  ;;  %v26_v4 = vld [vmem:[%s1826_s0 + $0x50] sm:$0xff] }
 0x3c3   :  { %v560_v10 = vpack.c.bf16 %v32_v6, %v26_v4 }
 0x3c4   :  { %v772_v62 = vmul.f32 1.442695, %v771_v61 }
 0x3c6   :  { %936 = vpow2.f32 %v772_v62 }
 0x3d0   :  { %v937_v63 = vpop.eup %936 }
 0x3d1   :  { %v1660_v0 = vsel %vm484_vm2, %v937_v63, 0.0 }
 0x3d2   :  { %775 = vadd.xlane.f32.xlu0 %v1660_v0 }
 0x409   :  { %v548_v2 = vpop.f32.mrb[8].mxu0 }
 0x40a   :  { %v549_v3 = vadd.f32 %v548_v2, %v254_v1  ;;  %v924_v5 = vpop.f32.mrb[9].mxu0  ;;  %v118_v1 = vld [vmem:[%s1826_s0 + $0x330] sm:$0xff]  ;;  %v120_v2 = vld [vmem:[%s1826_s0 + $0x340] sm:$0xff] }
 0x40b   :  { %v551_v18 = vpop.f32.mrb[10].mxu0 }
 0x40c   :  { %v554_v8 = vmax.f32 %v549_v3, 0.0  ;;  %v925_v9 = vpop.f32.mrb[11].mxu0  ;;  %v119_v3 = vld [vmem:[%s1826_s0 + $0x338] sm:$0xff] }
 0x40e   :  { %v555_v11 = vpack.c.bf16 %v554_v8, %v554_v8 }
 0x410   :  { %637 = vmatmul.mubr.bf16.vlgmr.msra.gmra.mrb[8].mxu1 %v555_v11  ;;  %678 = vmatmul.mubr.bf16.vlgmr.msra.gmra.mrb[12].mxu0 %v555_v11 }
 0x411   :  { %687 = vmatpush1.bf16.msra.mxu1 %v560_v10  ;;  %718 = vmatprep.mubr.bf16.mxu1 %v954_v59  ;;  %v116_v59 = vld [vmem:[%s1826_s0 + $0x320] sm:$0xff] }
 0x412   :  { %688 = vmatprep.subr.bf16.mxu1 %v567_v13  ;;  %v602_v60 = vpack.c.bf16 %v116_v59, %v110_v58 }
 0x415   :  { %689 = vmatpush1.bf16.msra.mxu1 %v566_v20 }
 0x416   :  { %690 = vmatprep.subr.bf16.mxu1 %v573_v21 }
 0x419   :  { %691 = vmatpush1.bf16.msra.mxu1 %v572_v27 }
 0x41a   :  { %692 = vmatprep.subr.bf16.mxu1 %v579_v29 }
 0x41d   :  { %693 = vmatpush1.bf16.msra.mxu1 %v578_v35 }
 0x41e   :  { %694 = vmatprep.subr.bf16.mxu1 %v585_v36 }
 0x421   :  { %695 = vmatpush1.bf16.msra.mxu1 %v584_v43 }
 0x422   :  { %696 = vmatprep.subr.bf16.mxu1 %v591_v44 }
 0x425   :  { %697 = vmatpush1.bf16.msra.mxu1 %v590_v49 }
 0x426   :  { %698 = vmatprep.subr.bf16.mxu1 %v597_v50 }
 0x429   :  { %699 = vmatpush1.bf16.msra.mxu1 %v596_v56 }
 0x42a   :  { %700 = vmatprep.subr.bf16.mxu1 %v603_v57 }
 0x42d   :  { %701 = vmatpush1.bf16.msra.mxu1 %v602_v60 }
 0x430   :  { %719 = vmatmul.mubr.bf16.vlgmr.msra.gmra.mrb[12].mxu1 %v555_v11 }
 0x45f   :  { %v776_v61 = vpop.xlane.xlu0 %775 }
 0x460   :  { %938 = vrcp.f32 %v776_v61 }
 0x46a   :  { %v939_v62 = vpop.eup %938 }
 0x46b   :  { %v778_v63 = vmul.f32 %v939_v62, %v1660_v0  ;;  %v121_v0 = vld [vmem:[%s1826_s0 + $0x348] sm:$0xff] }
 0x46d   :  { %779 = vst [vmem:[%s1830_s4] sm:$0xff] %v778_v63 }
 0x4e3   :  { %v638_v5 = vpop.f32.mrb[8].mxu1  ;;  %v679_v4 = vpop.f32.mrb[12].mxu0 }
 0x4e4   :  { %v639_v6 = vadd.f32 %v638_v5, %v118_v1  ;;  %v680_v18 = vadd.f32 %v679_v4, %v120_v2  ;;  %v640_v7 = vpop.f32.mrb[9].mxu1  ;;  %v681_v33 = vpop.f32.mrb[13].mxu0 }
 0x4e5   :  { %v641_v8 = vadd.f32 %v640_v7, %v119_v3  ;;  %v682_v9 = vadd.f32 %v681_v33, %v121_v0  ;;  %v642_v10 = vpop.f32.mrb[10].mxu1  ;;  %v683_v11 = vpop.f32.mrb[14].mxu0 }
 0x4e6   :  { %727 = vst [vmem:[%s1829_s3] sm:$0xff] %v639_v6  ;;  %v733_v13 = vsub.f32 %v639_v6, %v1196_v37  ;;  %729 = vst [vmem:[%s1829_s3 + $0x10] sm:$0xff] %v680_v18  ;;  %v735_v14 = vsub.f32 %v680_v18, %v1207_v42  ;;  %v643_v15 = vpop.f32.mrb[11].mxu1  ;;  %v684_v16 = vpop.f32.mrb[15].mxu0 }
 0x4e7   :  { %728 = vst [vmem:[%s1829_s3 + $0x8] sm:$0xff] %v641_v8  ;;  %v734_v19 = vsub.f32 %v641_v8, %v1143_v12  ;;  %730 = vst [vmem:[%s1829_s3 + $0x18] sm:$0xff] %v682_v9  ;;  %v736_v37 = vsub.f32 %v682_v9, %v1165_v22  ;;  %v122_v22 = vld [vmem:[%s1826_s0 + $0x350] sm:$0xff] }
 0x4e8   :  { %v739_v20 = vsel %vm503_vm6, %v733_v13, 0.0  ;;  %v741_v42 = vsel %vm503_vm6, %v735_v14, 0.0 }
 0x4e9   :  { %v745_v21 = vmul.f32 %v739_v20, %v739_v20  ;;  %v740_v23 = vsel %vm503_vm6, %v734_v19, 0.0  ;;  %v742_v12 = vsel %vm503_vm6, %v736_v37, 0.0  ;;  %v747_v25 = vmul.f32 %v741_v42, %v741_v42 }
 0x4ea   :  { %v746_v24 = vmul.f32 %v740_v23, %v740_v23  ;;  %v748_v27 = vmul.f32 %v742_v12, %v742_v12 }
 0x4ec   :  { %v751_v26 = vadd.f32 %v746_v24, %v745_v21 }
 0x4ee   :  { %v752_v29 = vadd.f32 %v751_v26, %v747_v25 }
 0x4f0   :  { %v753_v30 = vadd.f32 %v752_v29, %v748_v27 }
 0x503   :  { %v720_v32 = vpop.f32.mrb[12].mxu1 }
 0x504   :  { %v721_v34 = vadd.f32 %v720_v32, %v122_v22  ;;  %v722_v35 = vpop.f32.mrb[13].mxu1 }
 0x505   :  { %v723_v36 = vadd.f32 %v722_v35, %v123_v31  ;;  %v724_v38 = vpop.f32.mrb[14].mxu1 }
 0x506   :  { %731 = vst [vmem:[%s1829_s3 + $0x20] sm:$0xff] %v721_v34  ;;  %v737_v39 = vsub.f32 %v721_v34, %v1307_v28  ;;  %v725_v40 = vpop.f32.mrb[15].mxu1 }
 0x507   :  { %732 = vst [vmem:[%s1829_s3 + $0x28] sm:$0xff] %v723_v36  ;;  %v738_v41 = vsub.f32 %v723_v36, %v1228_v51 }
 0x508   :  { %v743_v43 = vsel %vm503_vm6, %v737_v39, 0.0 }
 0x509   :  { %v749_v44 = vmul.f32 %v743_v43, %v743_v43  ;;  %v744_v45 = vsel %vm503_vm6, %v738_v41, 0.0 }
 0x50a   :  { %v750_v46 = vmul.f32 %v744_v45, %v744_v45 }
 0x50b   :  { %v754_v47 = vadd.f32 %v753_v30, %v749_v44 }
 0x50d   :  { %v755_v48 = vadd.f32 %v754_v47, %v750_v46 }
 0x50f   :  { %756 = vadd.xlane.f32.xlu1 %v755_v48 }
 0x59c   :  { %v757_v49 = vpop.xlane.xlu1 %756 }
 0x59d   :  { %v758_v28 = vrot.slane %v757_v49, 4 }
 0x59f   :  { %v759_v50 = vadd.f32 %v758_v28, %v757_v49 }
 0x5a1   :  { %v760_v52 = vrot.slane %v759_v50, 2 }
 0x5a3   :  { %v761_v53 = vadd.f32 %v760_v52, %v759_v50 }
 0x5a5   :  { %v762_v54 = vrot.slane %v761_v53, 1 }
 0x5a7   :  { %v763_v55 = vadd.f32 %v762_v54, %v761_v53 }
 0x5a9   :  { %926 = vpush %v763_v55 }
 0x5da   :  { %s927_s0 = spop %926 }
 0x5db   :  { %s765_s3 = smul.f32 0.5, %s927_s0 }
 0x5dd   :  { %767 = sst [smem:[#allocation2]] %s765_s3 }
 0x5de   :  { %949 = shalt.err (!%p946_p2)
}
 0x5df   :  { %s955_s17 = smov [#allocation2]  }
 0x5e0   :  { %787 = dma.smem_to_hbm %s955_s17, 16, %s1828_s2, [#allocation3]  }
 0x5e1   :  { %950 = dma.done.wait [#allocation3], 16  }
 0x5e2   :  { %951 = vsyncadd [#allocation3], 4294967280 }
 0x5e3   :  { %799 = sfence }
 0x5e4   :  { %800 = vsyncpa [#allocation3], 1 }

</bundles_post_ra>
